<compile_context>
chip_gen: v5e
topology: v5e:2x2
jax: 0.10.0
libtpu: 0.0.40
codegen_flags: <defaults>
</compile_context>

<pallas_src>
import functools
import math

import jax
import jax.numpy as jnp
from jax import lax
from jax.experimental import pallas as pl
from jax.experimental.pallas import tpu as pltpu

_LN_EPS = 1e-5  # torch.nn.LayerNorm default


def _encoder_block_kernel(
    x_ref,        # (1, L, E)   full-sequence activations for this batch element
    wq_ref,       # (D, D)      query projection, 1/sqrt(D) pre-folded
    wk_ref,       # (D, D)
    wv_ref,       # (D, D)
    wo_ref,       # (E, E)      fc_out weight (in, out layout)
    bo_ref,       # (1, E)
    g1_ref,       # (1, E)      LayerNorm1 gamma
    b1_ref,       # (1, E)      LayerNorm1 beta
    w1_ref,       # (E, F)      FFN linear1
    fb1_ref,      # (1, F)
    w2_ref,       # (F, E)      FFN linear2
    fb2_ref,      # (1, E)
    g2_ref,       # (1, E)      LayerNorm2 gamma
    b2_ref,       # (1, E)      LayerNorm2 beta
    o_ref,        # (1, TL, E)
    k_scr,        # (H, L, D)   per-batch K cache
    v_scr,        # (H, L, D)   per-batch V cache
    cat_scr,      # (TL, E)     head-concat buffer (dense fc_out input)
    *, heads, head_dim, q_tile, mm_dtype,
):
    f32 = jnp.float32
    H, D, TL = heads, head_dim, q_tile
    lt = pl.program_id(1)

    # ---- K/V projections for the whole sequence, once per batch element ----
    @pl.when(lt == 0)
    def _():
        for h in range(H):
            xh = x_ref[0, :, h * D:(h + 1) * D].astype(mm_dtype)          # (L, D)
            k_scr[h] = jnp.dot(xh, wk_ref[...],
                               preferred_element_type=f32).astype(mm_dtype)
            v_scr[h] = jnp.dot(xh, wv_ref[...],
                               preferred_element_type=f32).astype(mm_dtype)

    # ---- current query tile (dense (TL, E) slab, also the residual) ----
    q0 = pl.multiple_of(lt * TL, TL)
    x_t = x_ref[0, pl.ds(q0, TL), :]                                      # (TL, E)

    # ---- multi-head attention, per head; deferred softmax normalization ----
    for h in range(H):
        xh = x_t[:, h * D:(h + 1) * D].astype(mm_dtype)                   # (TL, D)
        q_h = jnp.dot(xh, wq_ref[...], preferred_element_type=f32)        # scale folded in wq
        # scores: contract on the last dims of q and k (no explicit transpose)
        s = lax.dot_general(q_h.astype(mm_dtype), k_scr[h],
                            (((1,), (1,)), ((), ())),
                            preferred_element_type=f32)                   # (TL, L)
        # TODO(synk): optional attention mask (module default mask=None) not plumbed.
        m = jnp.max(s, axis=-1, keepdims=True)
        e = jnp.exp(s - m)
        denom = jnp.sum(e, axis=-1, keepdims=True)
        o_h = jnp.dot(e.astype(mm_dtype), v_scr[h],
                      preferred_element_type=f32)                         # (TL, D)
        o_h = o_h * pl.reciprocal(denom, approx=True)                     # deferred norm
        cat_scr[:, h * D:(h + 1) * D] = o_h.astype(mm_dtype)

    # fc_out: one dense matmul with K = E (head concat folded into cat_scr layout)
    attn = jnp.dot(cat_scr[...], wo_ref[...],
                   preferred_element_type=f32) + bo_ref[...].astype(f32)  # (TL, E)

    # ---- residual + LayerNorm 1 (f32) ----
    h1 = x_t.astype(f32) + attn
    mu1 = jnp.mean(h1, axis=-1, keepdims=True)
    xc1 = h1 - mu1
    var1 = jnp.mean(xc1 * xc1, axis=-1, keepdims=True)
    y1 = (xc1 * lax.rsqrt(var1 + _LN_EPS) * g1_ref[...].astype(f32)
          + b1_ref[...].astype(f32))                                      # (TL, E) f32

    # ---- position-wise feed-forward ----
    z = jnp.dot(y1.astype(mm_dtype), w1_ref[...],
                preferred_element_type=f32) + fb1_ref[...].astype(f32)
    z = jnp.maximum(z, 0.0)
    ffn = jnp.dot(z.astype(mm_dtype), w2_ref[...],
                  preferred_element_type=f32) + fb2_ref[...].astype(f32)

    # ---- residual + LayerNorm 2 (f32) ----
    h2 = y1 + ffn
    mu2 = jnp.mean(h2, axis=-1, keepdims=True)
    xc2 = h2 - mu2
    var2 = jnp.mean(xc2 * xc2, axis=-1, keepdims=True)
    y2 = (xc2 * lax.rsqrt(var2 + _LN_EPS) * g2_ref[...].astype(f32)
          + b2_ref[...].astype(f32))

    o_ref[0] = y2.astype(o_ref.dtype)


def encoder_block(x, wq, wk, wv, wo, bo, ln1_g, ln1_b,
                  w1, fb1, w2, fb2, ln2_g, ln2_b, *,
                  heads, q_tile=None, matmul_dtype=None):
    """x: (B, L, E). Weight matrices are in (in, out) layout. Returns (B, L, E).

    matmul_dtype: optionally run MXU contractions in a narrower dtype (e.g. bf16)
    while softmax / LayerNorm math stays in f32.
    """
    B, L, E = x.shape
    assert E % heads == 0, "embed size must be divisible by heads"
    D = E // heads
    F = w1.shape[1]
    if q_tile is None:
        q_tile = L if L <= 256 else 256
    assert L % q_tile == 0, "sequence length must be divisible by q_tile"
    n_tiles = L // q_tile

    mm_dt = x.dtype if matmul_dtype is None else jnp.dtype(matmul_dtype)

    # Fold 1/sqrt(D) into the query projection weight (zero in-kernel cost).
    wq_s = wq * (1.0 / math.sqrt(D))
    if matmul_dtype is not None:
        wq_s, wk, wv, wo, w1, w2 = (t.astype(mm_dt)
                                    for t in (wq_s, wk, wv, wo, w1, w2))

    row = lambda t: t.reshape(1, -1)

    def _const_spec(shape):
        zeros = (0,) * len(shape)
        # Constant across the whole grid: single-buffer to halve resident VMEM.
        return pl.BlockSpec(shape, lambda b, t: zeros,
                            pipeline_mode=pl.Buffered(1))

    in_specs = [
        pl.BlockSpec((1, L, E), lambda b, t: (b, 0, 0)),   # x (full sequence per batch)
        _const_spec((D, D)),            # wq (scaled)
        _const_spec((D, D)),            # wk
        _const_spec((D, D)),            # wv
        _const_spec((E, E)),            # wo
        _const_spec((1, E)),            # bo
        _const_spec((1, E)),            # ln1 gamma
        _const_spec((1, E)),            # ln1 beta
        _const_spec((E, F)),            # w1
        _const_spec((1, F)),            # fb1
        _const_spec((F, E)),            # w2
        _const_spec((1, E)),            # fb2
        _const_spec((1, E)),            # ln2 gamma
        _const_spec((1, E)),            # ln2 beta
    ]

    mm_bytes = jnp.dtype(mm_dt).itemsize
    x_bytes = jnp.dtype(x.dtype).itemsize
    est_vmem = ((3 * D * D + E * E + E * F + F * E) * mm_bytes        # weights (1-buffered)
                + (5 * E + F) * 4                                     # biases / ln params
                + 2 * L * E * x_bytes                                 # x block (2-buffered)
                + 2 * q_tile * E * x_bytes                            # out block
                + (2 * heads * L * D + q_tile * E) * mm_bytes         # scratch
                + (2 * q_tile * L + 8 * q_tile * max(E, F)) * 4)      # f32 working set
    vmem_limit = int(min(max(2 * est_vmem, 32 * 1024 * 1024), 64 * 1024 * 1024))

    flops = B * (6 * L * D * E        # q/k/v projections
                 + 4 * L * L * E      # QK^T + PV
                 + 2 * L * E * E      # fc_out
                 + 4 * L * E * F)     # FFN
    bytes_accessed = (2 * B * L * E * x_bytes
                      + (3 * D * D + E * E + 2 * E * F) * mm_bytes
                      + (5 * E + F) * 4)
    cost = pl.CostEstimate(flops=flops,
                           transcendentals=B * heads * L * L,
                           bytes_accessed=bytes_accessed)

    kernel = functools.partial(_encoder_block_kernel, heads=heads, head_dim=D,
                               q_tile=q_tile, mm_dtype=mm_dt)

    return pl.pallas_call(
        kernel,
        out_shape=jax.ShapeDtypeStruct((B, L, E), x.dtype),
        grid_spec=pltpu.PrefetchScalarGridSpec(
            num_scalar_prefetch=0,
            grid=(B, n_tiles),
            in_specs=in_specs,
            out_specs=pl.BlockSpec((1, q_tile, E), lambda b, t: (b, t, 0)),
            scratch_shapes=[
                pltpu.VMEM((heads, L, D), mm_dt),   # K cache
                pltpu.VMEM((heads, L, D), mm_dt),   # V cache
                pltpu.VMEM((q_tile, E), mm_dt),     # head-concat buffer
            ],
        ),
        compiler_params=pltpu.CompilerParams(
            dimension_semantics=("parallel", "arbitrary"),
            vmem_limit_bytes=vmem_limit,
        ),
        cost_estimate=cost,
    )(x, wq_s, wk, wv, wo, row(bo), row(ln1_g), row(ln1_b),
      w1, row(fb1), w2, row(fb2), row(ln2_g), row(ln2_b))


# ----------------------------- pure-JAX reference -----------------------------

def _layernorm_ref(h, g, b):
    mu = jnp.mean(h, axis=-1, keepdims=True)
    var = jnp.mean((h - mu) ** 2, axis=-1, keepdims=True)
    return (h - mu) * lax.rsqrt(var + _LN_EPS) * g + b


def _reference(x, wq, wk, wv, wo, bo, ln1_g, ln1_b,
               w1, fb1, w2, fb2, ln2_g, ln2_b, *, heads):
    B, L, E = x.shape
    D = E // heads
    hi = lax.Precision.HIGHEST
    xs = jnp.transpose(x.reshape(B, L, heads, D), (0, 2, 1, 3))        # (B, H, L, D)
    q = jnp.einsum("bhld,de->bhle", xs, wq, precision=hi)
    k = jnp.einsum("bhld,de->bhle", xs, wk, precision=hi)
    v = jnp.einsum("bhld,de->bhle", xs, wv, precision=hi)
    s = jnp.einsum("bhld,bhmd->bhlm", q, k, precision=hi) / math.sqrt(D)
    p = jax.nn.softmax(s, axis=-1)
    o = jnp.einsum("bhlm,bhmd->bhld", p, v, precision=hi)
    o = jnp.transpose(o, (0, 2, 1, 3)).reshape(B, L, E)
    attn = jnp.einsum("ble,ef->blf", o, wo, precision=hi) + bo
    y1 = _layernorm_ref(x + attn, ln1_g, ln1_b)
    z = jnp.maximum(jnp.einsum("ble,ef->blf", y1, w1, precision=hi) + fb1, 0.0)
    ffn = jnp.einsum("blf,fe->ble", z, w2, precision=hi) + fb2
    return _layernorm_ref(y1 + ffn, ln2_g, ln2_b)


if __name__ == "__main__":
    # Small shapes consistent with the module: x is (batch, seq, embed).
    B, L, E, H, F = 2, 8, 32, 4, 64
    D = E // H
    dt = jnp.float32

    ks = jax.random.split(jax.random.PRNGKey(0), 14)
    x = jax.random.normal(ks[0], (B, L, E), dt)
    wq = jax.random.normal(ks[1], (D, D), dt) / math.sqrt(D)
    wk = jax.random.normal(ks[2], (D, D), dt) / math.sqrt(D)
    wv = jax.random.normal(ks[3], (D, D), dt) / math.sqrt(D)
    wo = jax.random.normal(ks[4], (E, E), dt) / math.sqrt(E)
    bo = 0.1 * jax.random.normal(ks[5], (E,), dt)
    ln1_g = 1.0 + 0.1 * jax.random.normal(ks[6], (E,), dt)
    ln1_b = 0.1 * jax.random.normal(ks[7], (E,), dt)
    w1 = jax.random.normal(ks[8], (E, F), dt) / math.sqrt(E)
    fb1 = 0.1 * jax.random.normal(ks[9], (F,), dt)
    w2 = jax.random.normal(ks[10], (F, E), dt) / math.sqrt(F)
    fb2 = 0.1 * jax.random.normal(ks[11], (E,), dt)
    ln2_g = 1.0 + 0.1 * jax.random.normal(ks[12], (E,), dt)
    ln2_b = 0.1 * jax.random.normal(ks[13], (E,), dt)

    out = encoder_block(x, wq, wk, wv, wo, bo, ln1_g, ln1_b,
                        w1, fb1, w2, fb2, ln2_g, ln2_b, heads=H)
    out = jax.block_until_ready(out)

    ref = _reference(x, wq, wk, wv, wo, bo, ln1_g, ln1_b,
                     w1, fb1, w2, fb2, ln2_g, ln2_b, heads=H)

    assert out.shape == (B, L, E)
    max_err = float(jnp.max(jnp.abs(out - ref)))
    # approx reciprocal + MXU accumulation order => slightly looser tolerance
    assert jnp.allclose(out, ref, atol=2e-2, rtol=2e-2), \
        f"mismatch vs reference, max abs err={max_err}"
    print("KERNEL_OK")
</pallas_src>

<mosaic_0001>
module attributes {stable_mosaic.version = 11 : i64} {
  func.func @_encoder_block_kernel(%arg0: i32, %arg1: i32, %arg2: memref<1x8x32xf32, #tpu.memory_space<vmem>>, %arg3: memref<8x8xf32, #tpu.memory_space<vmem>>, %arg4: memref<8x8xf32, #tpu.memory_space<vmem>>, %arg5: memref<8x8xf32, #tpu.memory_space<vmem>>, %arg6: memref<32x32xf32, #tpu.memory_space<vmem>>, %arg7: memref<1x32xf32, #tpu.memory_space<vmem>>, %arg8: memref<1x32xf32, #tpu.memory_space<vmem>>, %arg9: memref<1x32xf32, #tpu.memory_space<vmem>>, %arg10: memref<32x64xf32, #tpu.memory_space<vmem>>, %arg11: memref<1x64xf32, #tpu.memory_space<vmem>>, %arg12: memref<64x32xf32, #tpu.memory_space<vmem>>, %arg13: memref<1x32xf32, #tpu.memory_space<vmem>>, %arg14: memref<1x32xf32, #tpu.memory_space<vmem>>, %arg15: memref<1x32xf32, #tpu.memory_space<vmem>>, %arg16: memref<1x8x32xf32, #tpu.memory_space<vmem>>, %arg17: memref<4x8x8xf32, #tpu.memory_space<vmem>>, %arg18: memref<4x8x8xf32, #tpu.memory_space<vmem>>, %arg19: memref<8x32xf32, #tpu.memory_space<vmem>>) attributes {dimension_semantics = [#tpu.dimension_semantics<parallel>, #tpu.dimension_semantics<arbitrary>], iteration_bounds = array<i64: 2, 1>, scalar_prefetch = 0 : i64, scratch_operands = 3 : i64, tpu.core_type = #tpu.core_type<tc>, window_params = [{transform_indices = @transform_0, window_bounds = array<i64: 1, 8, 32>}, {pipeline_mode = #tpu.pipeline_mode<synchronous>, transform_indices = @transform_1, window_bounds = array<i64: 8, 8>}, {pipeline_mode = #tpu.pipeline_mode<synchronous>, transform_indices = @transform_2, window_bounds = array<i64: 8, 8>}, {pipeline_mode = #tpu.pipeline_mode<synchronous>, transform_indices = @transform_3, window_bounds = array<i64: 8, 8>}, {pipeline_mode = #tpu.pipeline_mode<synchronous>, transform_indices = @transform_4, window_bounds = array<i64: 32, 32>}, {pipeline_mode = #tpu.pipeline_mode<synchronous>, transform_indices = @transform_5, window_bounds = array<i64: 1, 32>}, {pipeline_mode = #tpu.pipeline_mode<synchronous>, transform_indices = @transform_6, window_bounds = array<i64: 1, 32>}, {pipeline_mode = #tpu.pipeline_mode<synchronous>, transform_indices = @transform_7, window_bounds = array<i64: 1, 32>}, {pipeline_mode = #tpu.pipeline_mode<synchronous>, transform_indices = @transform_8, window_bounds = array<i64: 32, 64>}, {pipeline_mode = #tpu.pipeline_mode<synchronous>, transform_indices = @transform_9, window_bounds = array<i64: 1, 64>}, {pipeline_mode = #tpu.pipeline_mode<synchronous>, transform_indices = @transform_10, window_bounds = array<i64: 64, 32>}, {pipeline_mode = #tpu.pipeline_mode<synchronous>, transform_indices = @transform_11, window_bounds = array<i64: 1, 32>}, {pipeline_mode = #tpu.pipeline_mode<synchronous>, transform_indices = @transform_12, window_bounds = array<i64: 1, 32>}, {pipeline_mode = #tpu.pipeline_mode<synchronous>, transform_indices = @transform_13, window_bounds = array<i64: 1, 32>}, {transform_indices = @transform_14, window_bounds = array<i64: 1, 8, 32>}]} {
    %c0_i32 = arith.constant 0 : i32
    %0 = arith.cmpi eq, %arg1, %c0_i32 : i32
    %1 = arith.extui %0 : i1 to i32
    %c0_i32_0 = arith.constant 0 : i32
    %2 = arith.cmpi ne, %1, %c0_i32_0 : i32
    scf.if %2 {
      %c0_94 = arith.constant 0 : index
      %c0_95 = arith.constant 0 : index
      %c0_96 = arith.constant 0 : index
      %155 = vector.load %arg2[%c0_94, %c0_95, %c0_96] : memref<1x8x32xf32, #tpu.memory_space<vmem>>, vector<1x8x8xf32>
      %156 = vector.shape_cast %155 : vector<1x8x8xf32> to vector<8x8xf32>
      %c0_97 = arith.constant 0 : index
      %c0_98 = arith.constant 0 : index
      %157 = vector.load %arg4[%c0_97, %c0_98] : memref<8x8xf32, #tpu.memory_space<vmem>>, vector<8x8xf32>
      %cst_99 = arith.constant dense<0.000000e+00> : vector<8x8xf32>
      %158 = tpu.matmul %156, %157, %cst_99 {dimension_numbers = #tpu.dot_dimension_numbers<[1], [0], [0], [1], [0, 0, 1, 1], [], []>} : vector<8x8xf32>, vector<8x8xf32>, vector<8x8xf32> -> vector<8x8xf32>
      %c0_100 = arith.constant 0 : index
      %c0_101 = arith.constant 0 : index
      %c0_102 = arith.constant 0 : index
      %159 = vector.load %arg17[%c0_100, %c0_101, %c0_102] : memref<4x8x8xf32, #tpu.memory_space<vmem>>, vector<1x8x8xf32>
      %160 = vector.shape_cast %159 : vector<1x8x8xf32> to vector<8x8xf32>
      %161 = vector.shape_cast %158 : vector<8x8xf32> to vector<1x8x8xf32>
      tpu.vector_store %arg17[%c0_100, %c0_101, %c0_102], %161 {strides = array<i32>} : memref<4x8x8xf32, #tpu.memory_space<vmem>>, vector<1x8x8xf32>,
      %c0_103 = arith.constant 0 : index
      %c0_104 = arith.constant 0 : index
      %162 = vector.load %arg5[%c0_103, %c0_104] : memref<8x8xf32, #tpu.memory_space<vmem>>, vector<8x8xf32>
      %cst_105 = arith.constant dense<0.000000e+00> : vector<8x8xf32>
      %163 = tpu.matmul %156, %162, %cst_105 {dimension_numbers = #tpu.dot_dimension_numbers<[1], [0], [0], [1], [0, 0, 1, 1], [], []>} : vector<8x8xf32>, vector<8x8xf32>, vector<8x8xf32> -> vector<8x8xf32>
      %c0_106 = arith.constant 0 : index
      %c0_107 = arith.constant 0 : index
      %c0_108 = arith.constant 0 : index
      %164 = vector.load %arg18[%c0_106, %c0_107, %c0_108] : memref<4x8x8xf32, #tpu.memory_space<vmem>>, vector<1x8x8xf32>
      %165 = vector.shape_cast %164 : vector<1x8x8xf32> to vector<8x8xf32>
      %166 = vector.shape_cast %163 : vector<8x8xf32> to vector<1x8x8xf32>
      tpu.vector_store %arg18[%c0_106, %c0_107, %c0_108], %166 {strides = array<i32>} : memref<4x8x8xf32, #tpu.memory_space<vmem>>, vector<1x8x8xf32>,
      %c0_109 = arith.constant 0 : index
      %c0_110 = arith.constant 0 : index
      %c8_111 = arith.constant 8 : index
      %167 = vector.load %arg2[%c0_109, %c0_110, %c8_111] : memref<1x8x32xf32, #tpu.memory_space<vmem>>, vector<1x8x8xf32>
      %168 = vector.shape_cast %167 : vector<1x8x8xf32> to vector<8x8xf32>
      %c0_112 = arith.constant 0 : index
      %c0_113 = arith.constant 0 : index
      %169 = vector.load %arg4[%c0_112, %c0_113] : memref<8x8xf32, #tpu.memory_space<vmem>>, vector<8x8xf32>
      %cst_114 = arith.constant dense<0.000000e+00> : vector<8x8xf32>
      %170 = tpu.matmul %168, %169, %cst_114 {dimension_numbers = #tpu.dot_dimension_numbers<[1], [0], [0], [1], [0, 0, 1, 1], [], []>} : vector<8x8xf32>, vector<8x8xf32>, vector<8x8xf32> -> vector<8x8xf32>
      %c1_115 = arith.constant 1 : index
      %c0_116 = arith.constant 0 : index
      %c0_117 = arith.constant 0 : index
      %171 = vector.load %arg17[%c1_115, %c0_116, %c0_117] : memref<4x8x8xf32, #tpu.memory_space<vmem>>, vector<1x8x8xf32>
      %172 = vector.shape_cast %171 : vector<1x8x8xf32> to vector<8x8xf32>
      %173 = vector.shape_cast %170 : vector<8x8xf32> to vector<1x8x8xf32>
      tpu.vector_store %arg17[%c1_115, %c0_116, %c0_117], %173 {strides = array<i32>} : memref<4x8x8xf32, #tpu.memory_space<vmem>>, vector<1x8x8xf32>,
      %c0_118 = arith.constant 0 : index
      %c0_119 = arith.constant 0 : index
      %174 = vector.load %arg5[%c0_118, %c0_119] : memref<8x8xf32, #tpu.memory_space<vmem>>, vector<8x8xf32>
      %cst_120 = arith.constant dense<0.000000e+00> : vector<8x8xf32>
      %175 = tpu.matmul %168, %174, %cst_120 {dimension_numbers = #tpu.dot_dimension_numbers<[1], [0], [0], [1], [0, 0, 1, 1], [], []>} : vector<8x8xf32>, vector<8x8xf32>, vector<8x8xf32> -> vector<8x8xf32>
      %c1_121 = arith.constant 1 : index
      %c0_122 = arith.constant 0 : index
      %c0_123 = arith.constant 0 : index
      %176 = vector.load %arg18[%c1_121, %c0_122, %c0_123] : memref<4x8x8xf32, #tpu.memory_space<vmem>>, vector<1x8x8xf32>
      %177 = vector.shape_cast %176 : vector<1x8x8xf32> to vector<8x8xf32>
      %178 = vector.shape_cast %175 : vector<8x8xf32> to vector<1x8x8xf32>
      tpu.vector_store %arg18[%c1_121, %c0_122, %c0_123], %178 {strides = array<i32>} : memref<4x8x8xf32, #tpu.memory_space<vmem>>, vector<1x8x8xf32>,
      %c0_124 = arith.constant 0 : index
      %c0_125 = arith.constant 0 : index
      %c16_126 = arith.constant 16 : index
      %179 = vector.load %arg2[%c0_124, %c0_125, %c16_126] : memref<1x8x32xf32, #tpu.memory_space<vmem>>, vector<1x8x8xf32>
      %180 = vector.shape_cast %179 : vector<1x8x8xf32> to vector<8x8xf32>
      %c0_127 = arith.constant 0 : index
      %c0_128 = arith.constant 0 : index
      %181 = vector.load %arg4[%c0_127, %c0_128] : memref<8x8xf32, #tpu.memory_space<vmem>>, vector<8x8xf32>
      %cst_129 = arith.constant dense<0.000000e+00> : vector<8x8xf32>
      %182 = tpu.matmul %180, %181, %cst_129 {dimension_numbers = #tpu.dot_dimension_numbers<[1], [0], [0], [1], [0, 0, 1, 1], [], []>} : vector<8x8xf32>, vector<8x8xf32>, vector<8x8xf32> -> vector<8x8xf32>
      %c2_130 = arith.constant 2 : index
      %c0_131 = arith.constant 0 : index
      %c0_132 = arith.constant 0 : index
      %183 = vector.load %arg17[%c2_130, %c0_131, %c0_132] : memref<4x8x8xf32, #tpu.memory_space<vmem>>, vector<1x8x8xf32>
      %184 = vector.shape_cast %183 : vector<1x8x8xf32> to vector<8x8xf32>
      %185 = vector.shape_cast %182 : vector<8x8xf32> to vector<1x8x8xf32>
      tpu.vector_store %arg17[%c2_130, %c0_131, %c0_132], %185 {strides = array<i32>} : memref<4x8x8xf32, #tpu.memory_space<vmem>>, vector<1x8x8xf32>,
      %c0_133 = arith.constant 0 : index
      %c0_134 = arith.constant 0 : index
      %186 = vector.load %arg5[%c0_133, %c0_134] : memref<8x8xf32, #tpu.memory_space<vmem>>, vector<8x8xf32>
      %cst_135 = arith.constant dense<0.000000e+00> : vector<8x8xf32>
      %187 = tpu.matmul %180, %186, %cst_135 {dimension_numbers = #tpu.dot_dimension_numbers<[1], [0], [0], [1], [0, 0, 1, 1], [], []>} : vector<8x8xf32>, vector<8x8xf32>, vector<8x8xf32> -> vector<8x8xf32>
      %c2_136 = arith.constant 2 : index
      %c0_137 = arith.constant 0 : index
      %c0_138 = arith.constant 0 : index
      %188 = vector.load %arg18[%c2_136, %c0_137, %c0_138] : memref<4x8x8xf32, #tpu.memory_space<vmem>>, vector<1x8x8xf32>
      %189 = vector.shape_cast %188 : vector<1x8x8xf32> to vector<8x8xf32>
      %190 = vector.shape_cast %187 : vector<8x8xf32> to vector<1x8x8xf32>
      tpu.vector_store %arg18[%c2_136, %c0_137, %c0_138], %190 {strides = array<i32>} : memref<4x8x8xf32, #tpu.memory_space<vmem>>, vector<1x8x8xf32>,
      %c0_139 = arith.constant 0 : index
      %c0_140 = arith.constant 0 : index
      %c24_141 = arith.constant 24 : index
      %191 = vector.load %arg2[%c0_139, %c0_140, %c24_141] : memref<1x8x32xf32, #tpu.memory_space<vmem>>, vector<1x8x8xf32>
      %192 = vector.shape_cast %191 : vector<1x8x8xf32> to vector<8x8xf32>
      %c0_142 = arith.constant 0 : index
      %c0_143 = arith.constant 0 : index
      %193 = vector.load %arg4[%c0_142, %c0_143] : memref<8x8xf32, #tpu.memory_space<vmem>>, vector<8x8xf32>
      %cst_144 = arith.constant dense<0.000000e+00> : vector<8x8xf32>
      %194 = tpu.matmul %192, %193, %cst_144 {dimension_numbers = #tpu.dot_dimension_numbers<[1], [0], [0], [1], [0, 0, 1, 1], [], []>} : vector<8x8xf32>, vector<8x8xf32>, vector<8x8xf32> -> vector<8x8xf32>
      %c3_145 = arith.constant 3 : index
      %c0_146 = arith.constant 0 : index
      %c0_147 = arith.constant 0 : index
      %195 = vector.load %arg17[%c3_145, %c0_146, %c0_147] : memref<4x8x8xf32, #tpu.memory_space<vmem>>, vector<1x8x8xf32>
      %196 = vector.shape_cast %195 : vector<1x8x8xf32> to vector<8x8xf32>
      %197 = vector.shape_cast %194 : vector<8x8xf32> to vector<1x8x8xf32>
      tpu.vector_store %arg17[%c3_145, %c0_146, %c0_147], %197 {strides = array<i32>} : memref<4x8x8xf32, #tpu.memory_space<vmem>>, vector<1x8x8xf32>,
      %c0_148 = arith.constant 0 : index
      %c0_149 = arith.constant 0 : index
      %198 = vector.load %arg5[%c0_148, %c0_149] : memref<8x8xf32, #tpu.memory_space<vmem>>, vector<8x8xf32>
      %cst_150 = arith.constant dense<0.000000e+00> : vector<8x8xf32>
      %199 = tpu.matmul %192, %198, %cst_150 {dimension_numbers = #tpu.dot_dimension_numbers<[1], [0], [0], [1], [0, 0, 1, 1], [], []>} : vector<8x8xf32>, vector<8x8xf32>, vector<8x8xf32> -> vector<8x8xf32>
      %c3_151 = arith.constant 3 : index
      %c0_152 = arith.constant 0 : index
      %c0_153 = arith.constant 0 : index
      %200 = vector.load %arg18[%c3_151, %c0_152, %c0_153] : memref<4x8x8xf32, #tpu.memory_space<vmem>>, vector<1x8x8xf32>
      %201 = vector.shape_cast %200 : vector<1x8x8xf32> to vector<8x8xf32>
      %202 = vector.shape_cast %199 : vector<8x8xf32> to vector<1x8x8xf32>
      tpu.vector_store %arg18[%c3_151, %c0_152, %c0_153], %202 {strides = array<i32>} : memref<4x8x8xf32, #tpu.memory_space<vmem>>, vector<1x8x8xf32>,
    } else {
    }
    %c8_i32 = arith.constant 8 : i32
    %3 = arith.muli %arg1, %c8_i32 : i32
    %4 = tpu.assume_multiple %3, 8 : i32
    %c0 = arith.constant 0 : index
    %5 = arith.index_cast %4 : i32 to index
    %c0_1 = arith.constant 0 : index
    %6 = vector.load %arg2[%c0, %5, %c0_1] : memref<1x8x32xf32, #tpu.memory_space<vmem>>, vector<1x8x32xf32>
    %7 = vector.shape_cast %6 : vector<1x8x32xf32> to vector<8x32xf32>
    %8 = vector.extract_strided_slice %7 {offsets = [0, 0], sizes = [8, 8], strides = [1, 1]} : vector<8x32xf32> to vector<8x8xf32>
    %c0_2 = arith.constant 0 : index
    %c0_3 = arith.constant 0 : index
    %9 = vector.load %arg3[%c0_2, %c0_3] : memref<8x8xf32, #tpu.memory_space<vmem>>, vector<8x8xf32>
    %cst = arith.constant dense<0.000000e+00> : vector<8x8xf32>
    %10 = tpu.matmul %8, %9, %cst {dimension_numbers = #tpu.dot_dimension_numbers<[1], [0], [0], [1], [0, 0, 1, 1], [], []>} : vector<8x8xf32>, vector<8x8xf32>, vector<8x8xf32> -> vector<8x8xf32>
    %c0_4 = arith.constant 0 : index
    %c0_5 = arith.constant 0 : index
    %c0_6 = arith.constant 0 : index
    %11 = vector.load %arg17[%c0_4, %c0_5, %c0_6] : memref<4x8x8xf32, #tpu.memory_space<vmem>>, vector<1x8x8xf32>
    %12 = vector.shape_cast %11 : vector<1x8x8xf32> to vector<8x8xf32>
    %cst_7 = arith.constant dense<0.000000e+00> : vector<8x8xf32>
    %13 = tpu.matmul %10, %12, %cst_7 {dimension_numbers = #tpu.dot_dimension_numbers<[1], [1], [0], [0], [0, 0, 1, 0], [], []>} : vector<8x8xf32>, vector<8x8xf32>, vector<8x8xf32> -> vector<8x8xf32>
    %cst_8 = arith.constant dense<0xFF800000> : vector<8xf32>
    %14 = vector.multi_reduction <maximumf>, %13, %cst_8 [1] : vector<8x8xf32> to vector<8xf32>
    %15 = vector.shape_cast %14 : vector<8xf32> to vector<8x1xf32>
    %16 = vector.broadcast %15 : vector<8x1xf32> to vector<8x8xf32>
    %17 = arith.subf %13, %16 : vector<8x8xf32>
    %18 = math.exp %17 : vector<8x8xf32>
    %cst_9 = arith.constant dense<0.000000e+00> : vector<8xf32>
    %19 = vector.multi_reduction <add>, %18, %cst_9 [1] : vector<8x8xf32> to vector<8xf32>
    %20 = vector.shape_cast %19 : vector<8xf32> to vector<8x1xf32>
    %c0_10 = arith.constant 0 : index
    %c0_11 = arith.constant 0 : index
    %c0_12 = arith.constant 0 : index
    %21 = vector.load %arg18[%c0_10, %c0_11, %c0_12] : memref<4x8x8xf32, #tpu.memory_space<vmem>>, vector<1x8x8xf32>
    %22 = vector.shape_cast %21 : vector<1x8x8xf32> to vector<8x8xf32>
    %cst_13 = arith.constant dense<0.000000e+00> : vector<8x8xf32>
    %23 = tpu.matmul %18, %22, %cst_13 {dimension_numbers = #tpu.dot_dimension_numbers<[1], [0], [0], [1], [0, 0, 1, 1], [], []>} : vector<8x8xf32>, vector<8x8xf32>, vector<8x8xf32> -> vector<8x8xf32>
    %24 = tpu.reciprocal %20 {approx = true} : vector<8x1xf32> -> vector<8x1xf32>
    %25 = vector.broadcast %24 : vector<8x1xf32> to vector<8x8xf32>
    %26 = arith.mulf %23, %25 : vector<8x8xf32>
    %c0_14 = arith.constant 0 : index
    %c0_15 = arith.constant 0 : index
    %27 = vector.load %arg19[%c0_14, %c0_15] : memref<8x32xf32, #tpu.memory_space<vmem>>, vector<8x8xf32>
    tpu.vector_store %arg19[%c0_14, %c0_15], %26 {strides = array<i32>} : memref<8x32xf32, #tpu.memory_space<vmem>>, vector<8x8xf32>,
    %28 = vector.extract_strided_slice %7 {offsets = [0, 8], sizes = [8, 8], strides = [1, 1]} : vector<8x32xf32> to vector<8x8xf32>
    %c0_16 = arith.constant 0 : index
    %c0_17 = arith.constant 0 : index
    %29 = vector.load %arg3[%c0_16, %c0_17] : memref<8x8xf32, #tpu.memory_space<vmem>>, vector<8x8xf32>
    %cst_18 = arith.constant dense<0.000000e+00> : vector<8x8xf32>
    %30 = tpu.matmul %28, %29, %cst_18 {dimension_numbers = #tpu.dot_dimension_numbers<[1], [0], [0], [1], [0, 0, 1, 1], [], []>} : vector<8x8xf32>, vector<8x8xf32>, vector<8x8xf32> -> vector<8x8xf32>
    %c1 = arith.constant 1 : index
    %c0_19 = arith.constant 0 : index
    %c0_20 = arith.constant 0 : index
    %31 = vector.load %arg17[%c1, %c0_19, %c0_20] : memref<4x8x8xf32, #tpu.memory_space<vmem>>, vector<1x8x8xf32>
    %32 = vector.shape_cast %31 : vector<1x8x8xf32> to vector<8x8xf32>
    %cst_21 = arith.constant dense<0.000000e+00> : vector<8x8xf32>
    %33 = tpu.matmul %30, %32, %cst_21 {dimension_numbers = #tpu.dot_dimension_numbers<[1], [1], [0], [0], [0, 0, 1, 0], [], []>} : vector<8x8xf32>, vector<8x8xf32>, vector<8x8xf32> -> vector<8x8xf32>
    %cst_22 = arith.constant dense<0xFF800000> : vector<8xf32>
    %34 = vector.multi_reduction <maximumf>, %33, %cst_22 [1] : vector<8x8xf32> to vector<8xf32>
    %35 = vector.shape_cast %34 : vector<8xf32> to vector<8x1xf32>
    %36 = vector.broadcast %35 : vector<8x1xf32> to vector<8x8xf32>
    %37 = arith.subf %33, %36 : vector<8x8xf32>
    %38 = math.exp %37 : vector<8x8xf32>
    %cst_23 = arith.constant dense<0.000000e+00> : vector<8xf32>
    %39 = vector.multi_reduction <add>, %38, %cst_23 [1] : vector<8x8xf32> to vector<8xf32>
    %40 = vector.shape_cast %39 : vector<8xf32> to vector<8x1xf32>
    %c1_24 = arith.constant 1 : index
    %c0_25 = arith.constant 0 : index
    %c0_26 = arith.constant 0 : index
    %41 = vector.load %arg18[%c1_24, %c0_25, %c0_26] : memref<4x8x8xf32, #tpu.memory_space<vmem>>, vector<1x8x8xf32>
    %42 = vector.shape_cast %41 : vector<1x8x8xf32> to vector<8x8xf32>
    %cst_27 = arith.constant dense<0.000000e+00> : vector<8x8xf32>
    %43 = tpu.matmul %38, %42, %cst_27 {dimension_numbers = #tpu.dot_dimension_numbers<[1], [0], [0], [1], [0, 0, 1, 1], [], []>} : vector<8x8xf32>, vector<8x8xf32>, vector<8x8xf32> -> vector<8x8xf32>
    %44 = tpu.reciprocal %40 {approx = true} : vector<8x1xf32> -> vector<8x1xf32>
    %45 = vector.broadcast %44 : vector<8x1xf32> to vector<8x8xf32>
    %46 = arith.mulf %43, %45 : vector<8x8xf32>
    %c0_28 = arith.constant 0 : index
    %c8 = arith.constant 8 : index
    %47 = vector.load %arg19[%c0_28, %c8] : memref<8x32xf32, #tpu.memory_space<vmem>>, vector<8x8xf32>
    tpu.vector_store %arg19[%c0_28, %c8], %46 {strides = array<i32>} : memref<8x32xf32, #tpu.memory_space<vmem>>, vector<8x8xf32>,
    %48 = vector.extract_strided_slice %7 {offsets = [0, 16], sizes = [8, 8], strides = [1, 1]} : vector<8x32xf32> to vector<8x8xf32>
    %c0_29 = arith.constant 0 : index
    %c0_30 = arith.constant 0 : index
    %49 = vector.load %arg3[%c0_29, %c0_30] : memref<8x8xf32, #tpu.memory_space<vmem>>, vector<8x8xf32>
    %cst_31 = arith.constant dense<0.000000e+00> : vector<8x8xf32>
    %50 = tpu.matmul %48, %49, %cst_31 {dimension_numbers = #tpu.dot_dimension_numbers<[1], [0], [0], [1], [0, 0, 1, 1], [], []>} : vector<8x8xf32>, vector<8x8xf32>, vector<8x8xf32> -> vector<8x8xf32>
    %c2 = arith.constant 2 : index
    %c0_32 = arith.constant 0 : index
    %c0_33 = arith.constant 0 : index
    %51 = vector.load %arg17[%c2, %c0_32, %c0_33] : memref<4x8x8xf32, #tpu.memory_space<vmem>>, vector<1x8x8xf32>
    %52 = vector.shape_cast %51 : vector<1x8x8xf32> to vector<8x8xf32>
    %cst_34 = arith.constant dense<0.000000e+00> : vector<8x8xf32>
    %53 = tpu.matmul %50, %52, %cst_34 {dimension_numbers = #tpu.dot_dimension_numbers<[1], [1], [0], [0], [0, 0, 1, 0], [], []>} : vector<8x8xf32>, vector<8x8xf32>, vector<8x8xf32> -> vector<8x8xf32>
    %cst_35 = arith.constant dense<0xFF800000> : vector<8xf32>
    %54 = vector.multi_reduction <maximumf>, %53, %cst_35 [1] : vector<8x8xf32> to vector<8xf32>
    %55 = vector.shape_cast %54 : vector<8xf32> to vector<8x1xf32>
    %56 = vector.broadcast %55 : vector<8x1xf32> to vector<8x8xf32>
    %57 = arith.subf %53, %56 : vector<8x8xf32>
    %58 = math.exp %57 : vector<8x8xf32>
    %cst_36 = arith.constant dense<0.000000e+00> : vector<8xf32>
    %59 = vector.multi_reduction <add>, %58, %cst_36 [1] : vector<8x8xf32> to vector<8xf32>
    %60 = vector.shape_cast %59 : vector<8xf32> to vector<8x1xf32>
    %c2_37 = arith.constant 2 : index
    %c0_38 = arith.constant 0 : index
    %c0_39 = arith.constant 0 : index
    %61 = vector.load %arg18[%c2_37, %c0_38, %c0_39] : memref<4x8x8xf32, #tpu.memory_space<vmem>>, vector<1x8x8xf32>
    %62 = vector.shape_cast %61 : vector<1x8x8xf32> to vector<8x8xf32>
    %cst_40 = arith.constant dense<0.000000e+00> : vector<8x8xf32>
    %63 = tpu.matmul %58, %62, %cst_40 {dimension_numbers = #tpu.dot_dimension_numbers<[1], [0], [0], [1], [0, 0, 1, 1], [], []>} : vector<8x8xf32>, vector<8x8xf32>, vector<8x8xf32> -> vector<8x8xf32>
    %64 = tpu.reciprocal %60 {approx = true} : vector<8x1xf32> -> vector<8x1xf32>
    %65 = vector.broadcast %64 : vector<8x1xf32> to vector<8x8xf32>
    %66 = arith.mulf %63, %65 : vector<8x8xf32>
    %c0_41 = arith.constant 0 : index
    %c16 = arith.constant 16 : index
    %67 = vector.load %arg19[%c0_41, %c16] : memref<8x32xf32, #tpu.memory_space<vmem>>, vector<8x8xf32>
    tpu.vector_store %arg19[%c0_41, %c16], %66 {strides = array<i32>} : memref<8x32xf32, #tpu.memory_space<vmem>>, vector<8x8xf32>,
    %68 = vector.extract_strided_slice %7 {offsets = [0, 24], sizes = [8, 8], strides = [1, 1]} : vector<8x32xf32> to vector<8x8xf32>
    %c0_42 = arith.constant 0 : index
    %c0_43 = arith.constant 0 : index
    %69 = vector.load %arg3[%c0_42, %c0_43] : memref<8x8xf32, #tpu.memory_space<vmem>>, vector<8x8xf32>
    %cst_44 = arith.constant dense<0.000000e+00> : vector<8x8xf32>
    %70 = tpu.matmul %68, %69, %cst_44 {dimension_numbers = #tpu.dot_dimension_numbers<[1], [0], [0], [1], [0, 0, 1, 1], [], []>} : vector<8x8xf32>, vector<8x8xf32>, vector<8x8xf32> -> vector<8x8xf32>
    %c3 = arith.constant 3 : index
    %c0_45 = arith.constant 0 : index
    %c0_46 = arith.constant 0 : index
    %71 = vector.load %arg17[%c3, %c0_45, %c0_46] : memref<4x8x8xf32, #tpu.memory_space<vmem>>, vector<1x8x8xf32>
    %72 = vector.shape_cast %71 : vector<1x8x8xf32> to vector<8x8xf32>
    %cst_47 = arith.constant dense<0.000000e+00> : vector<8x8xf32>
    %73 = tpu.matmul %70, %72, %cst_47 {dimension_numbers = #tpu.dot_dimension_numbers<[1], [1], [0], [0], [0, 0, 1, 0], [], []>} : vector<8x8xf32>, vector<8x8xf32>, vector<8x8xf32> -> vector<8x8xf32>
    %cst_48 = arith.constant dense<0xFF800000> : vector<8xf32>
    %74 = vector.multi_reduction <maximumf>, %73, %cst_48 [1] : vector<8x8xf32> to vector<8xf32>
    %75 = vector.shape_cast %74 : vector<8xf32> to vector<8x1xf32>
    %76 = vector.broadcast %75 : vector<8x1xf32> to vector<8x8xf32>
    %77 = arith.subf %73, %76 : vector<8x8xf32>
    %78 = math.exp %77 : vector<8x8xf32>
    %cst_49 = arith.constant dense<0.000000e+00> : vector<8xf32>
    %79 = vector.multi_reduction <add>, %78, %cst_49 [1] : vector<8x8xf32> to vector<8xf32>
    %80 = vector.shape_cast %79 : vector<8xf32> to vector<8x1xf32>
    %c3_50 = arith.constant 3 : index
    %c0_51 = arith.constant 0 : index
    %c0_52 = arith.constant 0 : index
    %81 = vector.load %arg18[%c3_50, %c0_51, %c0_52] : memref<4x8x8xf32, #tpu.memory_space<vmem>>, vector<1x8x8xf32>
    %82 = vector.shape_cast %81 : vector<1x8x8xf32> to vector<8x8xf32>
    %cst_53 = arith.constant dense<0.000000e+00> : vector<8x8xf32>
    %83 = tpu.matmul %78, %82, %cst_53 {dimension_numbers = #tpu.dot_dimension_numbers<[1], [0], [0], [1], [0, 0, 1, 1], [], []>} : vector<8x8xf32>, vector<8x8xf32>, vector<8x8xf32> -> vector<8x8xf32>
    %84 = tpu.reciprocal %80 {approx = true} : vector<8x1xf32> -> vector<8x1xf32>
    %85 = vector.broadcast %84 : vector<8x1xf32> to vector<8x8xf32>
    %86 = arith.mulf %83, %85 : vector<8x8xf32>
    %c0_54 = arith.constant 0 : index
    %c24 = arith.constant 24 : index
    %87 = vector.load %arg19[%c0_54, %c24] : memref<8x32xf32, #tpu.memory_space<vmem>>, vector<8x8xf32>
    tpu.vector_store %arg19[%c0_54, %c24], %86 {strides = array<i32>} : memref<8x32xf32, #tpu.memory_space<vmem>>, vector<8x8xf32>,
    %c0_55 = arith.constant 0 : index
    %c0_56 = arith.constant 0 : index
    %88 = vector.load %arg19[%c0_55, %c0_56] : memref<8x32xf32, #tpu.memory_space<vmem>>, vector<8x32xf32>
    %c0_57 = arith.constant 0 : index
    %c0_58 = arith.constant 0 : index
    %89 = vector.load %arg6[%c0_57, %c0_58] : memref<32x32xf32, #tpu.memory_space<vmem>>, vector<32x32xf32>
    %cst_59 = arith.constant dense<0.000000e+00> : vector<8x32xf32>
    %90 = tpu.matmul %88, %89, %cst_59 {dimension_numbers = #tpu.dot_dimension_numbers<[1], [0], [0], [1], [0, 0, 1, 1], [], []>} : vector<8x32xf32>, vector<32x32xf32>, vector<8x32xf32> -> vector<8x32xf32>
    %c0_60 = arith.constant 0 : index
    %c0_61 = arith.constant 0 : index
    %91 = vector.load %arg7[%c0_60, %c0_61] : memref<1x32xf32, #tpu.memory_space<vmem>>, vector<1x32xf32>
    %92 = vector.broadcast %91 : vector<1x32xf32> to vector<8x32xf32>
    %93 = arith.addf %90, %92 : vector<8x32xf32>
    %94 = arith.addf %7, %93 : vector<8x32xf32>
    %cst_62 = arith.constant dense<0.000000e+00> : vector<8xf32>
    %95 = vector.multi_reduction <add>, %94, %cst_62 [1] : vector<8x32xf32> to vector<8xf32>
    %96 = vector.shape_cast %95 : vector<8xf32> to vector<8x1xf32>
    %cst_63 = arith.constant 3.200000e+01 : f32
    %97 = vector.broadcast %cst_63 : f32 to vector<8x1xf32>
    %98 = arith.divf %96, %97 : vector<8x1xf32>
    %99 = vector.broadcast %98 : vector<8x1xf32> to vector<8x32xf32>
    %100 = arith.subf %94, %99 : vector<8x32xf32>
    %101 = arith.mulf %100, %100 : vector<8x32xf32>
    %cst_64 = arith.constant dense<0.000000e+00> : vector<8xf32>
    %102 = vector.multi_reduction <add>, %101, %cst_64 [1] : vector<8x32xf32> to vector<8xf32>
    %103 = vector.shape_cast %102 : vector<8xf32> to vector<8x1xf32>
    %cst_65 = arith.constant 3.200000e+01 : f32
    %104 = vector.broadcast %cst_65 : f32 to vector<8x1xf32>
    %105 = arith.divf %103, %104 : vector<8x1xf32>
    %cst_66 = arith.constant 9.99999974E-6 : f32
    %106 = vector.broadcast %cst_66 : f32 to vector<8x1xf32>
    %107 = arith.addf %105, %106 : vector<8x1xf32>
    %108 = math.rsqrt %107 : vector<8x1xf32>
    %109 = vector.broadcast %108 : vector<8x1xf32> to vector<8x32xf32>
    %110 = arith.mulf %100, %109 : vector<8x32xf32>
    %c0_67 = arith.constant 0 : index
    %c0_68 = arith.constant 0 : index
    %111 = vector.load %arg8[%c0_67, %c0_68] : memref<1x32xf32, #tpu.memory_space<vmem>>, vector<1x32xf32>
    %112 = vector.broadcast %111 : vector<1x32xf32> to vector<8x32xf32>
    %113 = arith.mulf %110, %112 : vector<8x32xf32>
    %c0_69 = arith.constant 0 : index
    %c0_70 = arith.constant 0 : index
    %114 = vector.load %arg9[%c0_69, %c0_70] : memref<1x32xf32, #tpu.memory_space<vmem>>, vector<1x32xf32>
    %115 = vector.broadcast %114 : vector<1x32xf32> to vector<8x32xf32>
    %116 = arith.addf %113, %115 : vector<8x32xf32>
    %c0_71 = arith.constant 0 : index
    %c0_72 = arith.constant 0 : index
    %117 = vector.load %arg10[%c0_71, %c0_72] : memref<32x64xf32, #tpu.memory_space<vmem>>, vector<32x64xf32>
    %cst_73 = arith.constant dense<0.000000e+00> : vector<8x64xf32>
    %118 = tpu.matmul %116, %117, %cst_73 {dimension_numbers = #tpu.dot_dimension_numbers<[1], [0], [0], [1], [0, 0, 1, 1], [], []>} : vector<8x32xf32>, vector<32x64xf32>, vector<8x64xf32> -> vector<8x64xf32>
    %c0_74 = arith.constant 0 : index
    %c0_75 = arith.constant 0 : index
    %119 = vector.load %arg11[%c0_74, %c0_75] : memref<1x64xf32, #tpu.memory_space<vmem>>, vector<1x64xf32>
    %120 = vector.broadcast %119 : vector<1x64xf32> to vector<8x64xf32>
    %121 = arith.addf %118, %120 : vector<8x64xf32>
    %cst_76 = arith.constant 0.000000e+00 : f32
    %122 = vector.broadcast %cst_76 : f32 to vector<8x64xf32>
    %123 = arith.maximumf %121, %122 : vector<8x64xf32>
    %c0_77 = arith.constant 0 : index
    %c0_78 = arith.constant 0 : index
    %124 = vector.load %arg12[%c0_77, %c0_78] : memref<64x32xf32, #tpu.memory_space<vmem>>, vector<64x32xf32>
    %cst_79 = arith.constant dense<0.000000e+00> : vector<8x32xf32>
    %125 = tpu.matmul %123, %124, %cst_79 {dimension_numbers = #tpu.dot_dimension_numbers<[1], [0], [0], [1], [0, 0, 1, 1], [], []>} : vector<8x64xf32>, vector<64x32xf32>, vector<8x32xf32> -> vector<8x32xf32>
    %c0_80 = arith.constant 0 : index
    %c0_81 = arith.constant 0 : index
    %126 = vector.load %arg13[%c0_80, %c0_81] : memref<1x32xf32, #tpu.memory_space<vmem>>, vector<1x32xf32>
    %127 = vector.broadcast %126 : vector<1x32xf32> to vector<8x32xf32>
    %128 = arith.addf %125, %127 : vector<8x32xf32>
    %129 = arith.addf %116, %128 : vector<8x32xf32>
    %cst_82 = arith.constant dense<0.000000e+00> : vector<8xf32>
    %130 = vector.multi_reduction <add>, %129, %cst_82 [1] : vector<8x32xf32> to vector<8xf32>
    %131 = vector.shape_cast %130 : vector<8xf32> to vector<8x1xf32>
    %cst_83 = arith.constant 3.200000e+01 : f32
    %132 = vector.broadcast %cst_83 : f32 to vector<8x1xf32>
    %133 = arith.divf %131, %132 : vector<8x1xf32>
    %134 = vector.broadcast %133 : vector<8x1xf32> to vector<8x32xf32>
    %135 = arith.subf %129, %134 : vector<8x32xf32>
    %136 = arith.mulf %135, %135 : vector<8x32xf32>
    %cst_84 = arith.constant dense<0.000000e+00> : vector<8xf32>
    %137 = vector.multi_reduction <add>, %136, %cst_84 [1] : vector<8x32xf32> to vector<8xf32>
    %138 = vector.shape_cast %137 : vector<8xf32> to vector<8x1xf32>
    %cst_85 = arith.constant 3.200000e+01 : f32
    %139 = vector.broadcast %cst_85 : f32 to vector<8x1xf32>
    %140 = arith.divf %138, %139 : vector<8x1xf32>
    %cst_86 = arith.constant 9.99999974E-6 : f32
    %141 = vector.broadcast %cst_86 : f32 to vector<8x1xf32>
    %142 = arith.addf %140, %141 : vector<8x1xf32>
    %143 = math.rsqrt %142 : vector<8x1xf32>
    %144 = vector.broadcast %143 : vector<8x1xf32> to vector<8x32xf32>
    %145 = arith.mulf %135, %144 : vector<8x32xf32>
    %c0_87 = arith.constant 0 : index
    %c0_88 = arith.constant 0 : index
    %146 = vector.load %arg14[%c0_87, %c0_88] : memref<1x32xf32, #tpu.memory_space<vmem>>, vector<1x32xf32>
    %147 = vector.broadcast %146 : vector<1x32xf32> to vector<8x32xf32>
    %148 = arith.mulf %145, %147 : vector<8x32xf32>
    %c0_89 = arith.constant 0 : index
    %c0_90 = arith.constant 0 : index
    %149 = vector.load %arg15[%c0_89, %c0_90] : memref<1x32xf32, #tpu.memory_space<vmem>>, vector<1x32xf32>
    %150 = vector.broadcast %149 : vector<1x32xf32> to vector<8x32xf32>
    %151 = arith.addf %148, %150 : vector<8x32xf32>
    %c0_91 = arith.constant 0 : index
    %c0_92 = arith.constant 0 : index
    %c0_93 = arith.constant 0 : index
    %152 = vector.load %arg16[%c0_91, %c0_92, %c0_93] : memref<1x8x32xf32, #tpu.memory_space<vmem>>, vector<1x8x32xf32>
    %153 = vector.shape_cast %152 : vector<1x8x32xf32> to vector<8x32xf32>
    %154 = vector.shape_cast %151 : vector<8x32xf32> to vector<1x8x32xf32>
    tpu.vector_store %arg16[%c0_91, %c0_92, %c0_93], %154 {strides = array<i32>} : memref<1x8x32xf32, #tpu.memory_space<vmem>>, vector<1x8x32xf32>,
    return
  }
  func.func @transform_0(%arg0: i32, %arg1: i32) -> (i32, i32, i32) {
    %c0_i32 = arith.constant 0 : i32
    %c0_i32_0 = arith.constant 0 : i32
    %c0_i32_1 = arith.constant 0 : i32
    return %arg0, %c0_i32, %c0_i32_0 : i32, i32, i32
  }
  func.func @transform_1(%arg0: i32, %arg1: i32) -> (i32, i32) {
    %c0_i32 = arith.constant 0 : i32
    %c0_i32_0 = arith.constant 0 : i32
    %c0_i32_1 = arith.constant 0 : i32
    return %c0_i32, %c0_i32_0 : i32, i32
  }
  func.func @transform_2(%arg0: i32, %arg1: i32) -> (i32, i32) {
    %c0_i32 = arith.constant 0 : i32
    %c0_i32_0 = arith.constant 0 : i32
    %c0_i32_1 = arith.constant 0 : i32
    return %c0_i32, %c0_i32_0 : i32, i32
  }
  func.func @transform_3(%arg0: i32, %arg1: i32) -> (i32, i32) {
    %c0_i32 = arith.constant 0 : i32
    %c0_i32_0 = arith.constant 0 : i32
    %c0_i32_1 = arith.constant 0 : i32
    return %c0_i32, %c0_i32_0 : i32, i32
  }
  func.func @transform_4(%arg0: i32, %arg1: i32) -> (i32, i32) {
    %c0_i32 = arith.constant 0 : i32
    %c0_i32_0 = arith.constant 0 : i32
    %c0_i32_1 = arith.constant 0 : i32
    return %c0_i32, %c0_i32_0 : i32, i32
  }
  func.func @transform_5(%arg0: i32, %arg1: i32) -> (i32, i32) {
    %c0_i32 = arith.constant 0 : i32
    %c0_i32_0 = arith.constant 0 : i32
    %c0_i32_1 = arith.constant 0 : i32
    return %c0_i32, %c0_i32_0 : i32, i32
  }
  func.func @transform_6(%arg0: i32, %arg1: i32) -> (i32, i32) {
    %c0_i32 = arith.constant 0 : i32
    %c0_i32_0 = arith.constant 0 : i32
    %c0_i32_1 = arith.constant 0 : i32
    return %c0_i32, %c0_i32_0 : i32, i32
  }
  func.func @transform_7(%arg0: i32, %arg1: i32) -> (i32, i32) {
    %c0_i32 = arith.constant 0 : i32
    %c0_i32_0 = arith.constant 0 : i32
    %c0_i32_1 = arith.constant 0 : i32
    return %c0_i32, %c0_i32_0 : i32, i32
  }
  func.func @transform_8(%arg0: i32, %arg1: i32) -> (i32, i32) {
    %c0_i32 = arith.constant 0 : i32
    %c0_i32_0 = arith.constant 0 : i32
    %c0_i32_1 = arith.constant 0 : i32
    return %c0_i32, %c0_i32_0 : i32, i32
  }
  func.func @transform_9(%arg0: i32, %arg1: i32) -> (i32, i32) {
    %c0_i32 = arith.constant 0 : i32
    %c0_i32_0 = arith.constant 0 : i32
    %c0_i32_1 = arith.constant 0 : i32
    return %c0_i32, %c0_i32_0 : i32, i32
  }
  func.func @transform_10(%arg0: i32, %arg1: i32) -> (i32, i32) {
    %c0_i32 = arith.constant 0 : i32
    %c0_i32_0 = arith.constant 0 : i32
    %c0_i32_1 = arith.constant 0 : i32
    return %c0_i32, %c0_i32_0 : i32, i32
  }
  func.func @transform_11(%arg0: i32, %arg1: i32) -> (i32, i32) {
    %c0_i32 = arith.constant 0 : i32
    %c0_i32_0 = arith.constant 0 : i32
    %c0_i32_1 = arith.constant 0 : i32
    return %c0_i32, %c0_i32_0 : i32, i32
  }
  func.func @transform_12(%arg0: i32, %arg1: i32) -> (i32, i32) {
    %c0_i32 = arith.constant 0 : i32
    %c0_i32_0 = arith.constant 0 : i32
    %c0_i32_1 = arith.constant 0 : i32
    return %c0_i32, %c0_i32_0 : i32, i32
  }
  func.func @transform_13(%arg0: i32, %arg1: i32) -> (i32, i32) {
    %c0_i32 = arith.constant 0 : i32
    %c0_i32_0 = arith.constant 0 : i32
    %c0_i32_1 = arith.constant 0 : i32
    return %c0_i32, %c0_i32_0 : i32, i32
  }
  func.func @transform_14(%arg0: i32, %arg1: i32) -> (i32, i32, i32) {
    %c0_i32 = arith.constant 0 : i32
    %c0_i32_0 = arith.constant 0 : i32
    return %arg0, %arg1, %c0_i32 : i32, i32, i32
  }
}

</mosaic_0001>

<bundles_post_ra>
// kernel: tpu_custom_call.1
= control target key start
LH: loop header
LB: loop body
LE: loop exit
PB: predicated region body
PF: predicated region fallthrough
CT: control target
= control target key end

     0   :  { %s1931_s0 = inlined_call_operand.vmem [shape: f32[2,8,32], index: 0, kind: input, shape index: {}]   ;;  %s1932_s1 = inlined_call_operand.vmem [shape: f32[8,8], index: 1, kind: input, shape index: {}]   ;;  %s1933_s2 = inlined_call_operand.vmem [shape: f32[8,8], index: 2, kind: input, shape index: {}]   ;;  %s1934_s3 = inlined_call_operand.hbm [shape: f32[8,8], index: 3, kind: input, shape index: {}]   ;;  %s1935_s4 = inlined_call_operand.vmem [shape: f32[32,32], index: 4, kind: input, shape index: {}]   ;;  %s1936_s5 = inlined_call_operand.vmem [shape: f32[1,32], index: 5, kind: input, shape index: {}]   ;;  %s1937_s6 = inlined_call_operand.vmem [shape: f32[1,32], index: 6, kind: input, shape index: {}]   ;;  %s1938_s7 = inlined_call_operand.vmem [shape: f32[1,32], index: 7, kind: input, shape index: {}]   ;;  %s1939_s8 = inlined_call_operand.vmem [shape: f32[32,64], index: 8, kind: input, shape index: {}]   ;;  %s1940_s9 = inlined_call_operand.vmem [shape: f32[1,64], index: 9, kind: input, shape index: {}]   ;;  %s1941_s10 = inlined_call_operand.vmem [shape: f32[64,32], index: 10, kind: input, shape index: {}]   ;;  %s1942_s11 = inlined_call_operand.vmem [shape: f32[1,32], index: 11, kind: input, shape index: {}]   ;;  %s1943_s12 = inlined_call_operand.vmem [shape: f32[1,32], index: 12, kind: input, shape index: {}]   ;;  %s1944_s13 = inlined_call_operand.vmem [shape: f32[1,32], index: 13, kind: input, shape index: {}]   ;;  %s1945_s14 = inlined_call_operand.hbm [shape: f32[2,8,32], index: 14, kind: output, shape index: {}]  }
   0x1   :  { %1948 = sst [smem:[#allocation13_spill]] %s1931_s0 }
   0x2   :  { %1949 = sst [smem:[#allocation14_spill]] %s1932_s1 }
   0x3   :  { %1950 = sst [smem:[#allocation15_spill]] %s1933_s2 }
   0x4   :  { %1951 = sst [smem:[#allocation16_spill]] %s1934_s3 }
   0x5   :  { %1952 = sst [smem:[#allocation17_spill]] %s1944_s13 }
   0x6   :  { %19 = vsyncpa [#allocation6], 0 }
   0x7   :  { %20 = vsyncpa [#allocation7], 0 }
   0x8   :  { %22 = vsyncpa [#allocation7 + $0x1], 0  ;;  %s1690_s29 = smov 0   ;;  %s1692_s30 = smov 0  }
   0x9   :  { %s1694_s15 = smov 0   ;;  %s1696_s16 = smov 0  }
   0xa   :  { %s1698_s17 = smov 0   ;;  %s1700_s18 = smov 0  }
   0xb LB: > { %1953 = sst [smem:[#allocation11_spill]] %s1585_s29  ;;  %s1351_s19 = sadd.s32 4294967295, %s1605_s18   ;;  %s1605_s18 = sphi %s1700_s18, %s28_s18   ;;  %s1601_s17 = sphi %s1698_s17, %s1968_s17   ;;  %s1597_s16 = sphi %s1696_s16, %s1967_s16   ;;  %s1593_s15 = sphi %s1694_s15, %s1966_s15   ;;  %s1589_s30 = sphi %s1692_s30, %s1965_s30   ;;  %s1585_s29 = sphi %s1690_s29, %s1964_s29  }
   0xc   : > { %s1352_s20 = sadd.s32 4294967294, %s1605_s18   ;;  %s40_s21 = sadd.s32 1, %s1601_s17 }
   0xd   : > { %s348_s22 = sadd.s32 1, %s1593_s15  ;;  %p42_p0 = scmp.ge.s32.totalorder %s40_s21, 2 }
   0xe   : > { %p358_p1 = scmp.ne.s32.totalorder %s1593_s15, %s1589_s30  ;;  %p359_p2 = scmp.eq.s32.totalorder %s1351_s19, 1 }
   0xf   : > { %p364_p3 = scmp.ne.s32.totalorder %s1589_s30, %s1585_s29  ;;  %s1970_s21 = smov (%p42_p0, %s40_s21), 0 }
  0x10   : > { %1954 = sst [smem:[#allocation12_spill]] %s1970_s21  ;;  %p1730_p4 = por %p359_p2, %p358_p1 }
  0x11   : > { %p365_p5 = scmp.eq.s32.totalorder %s1352_s20, 1  ;;  %s343_s24 = ssub.s32 %s1601_s17, %s1970_s21 }
  0x12   : > { %p1353_p6 = scmp.ge.s32.totalorder %s1605_s18, 1  ;;  %p346_p7 = scmp.eq.s32.totalorder %s343_s24, 0 }
  0x13   : > { %p1737_p8 = por %p365_p5, %p364_p3  ;;  %p372_p9 = scmp.lt.s32.totalorder %s1605_s18, 3 }
  0x14   : > { %s1743_s26 = scalar_select %p346_p7, %s1593_s15, %s348_s22  }
  0x15   : > { %p373_p10 = pnand %p1353_p6, %p372_p9  ;;  %p1405_p11 = scmp.eq.s32.totalorder %s1351_s19, 0 }
  0x16   : > { %s1957_s3 = sld [smem:[#allocation16_spill]]  ;;  %s1607_s13 = smov [#allocation5]  }
  0x17   : > { %p1397_p12 = pneg %p373_p10  ;;  %s392_s20 = sshll.u32 %s1607_s13, 4  ;;  %s393_s20 = int_to_ptr.vmem [resolvable:$true] %s392_s20 }
  0x19   : > { %p1398_p13 = pnand %p1405_p11, %p1397_p12  ;;  %442 = sbr.rel (%p373_p10) target bundleno = 2150 (0x866), region = 76 }
  0x1c   : > { %s390_s29 = sshll.u32 %s1957_s3, 4  ;;  %s391_s29 = int_to_ptr.hbm [resolvable:$true] %s390_s29 }
  0x1d   : > { %1400 = dma.hbm_to_vmem [thread:$0]  (!%p1398_p13), %s391_s29, 128, %s393_s20, [#allocation6]  }
  0x1e   : > { %1576 = dma.done.wait (%p1405_p11), [#allocation6], 128  }
  0x1f   : > { %1578 = vsyncadd (%p1405_p11), [#allocation6], 4294967168  ;;  %p488_p0 = scmp.lt.s32.totalorder %s1597_s16, 1  ;;  %s1958_s0 = sld [smem:[#allocation13_spill]]  ;;  %vm498_vm0 = vcmask 64512   ;;  %v574_v2 = vld [vmem:[#allocation5] sm:$0xff] }
  0x20   : > { %s1959_s2 = sld [smem:[#allocation15_spill]]  ;;  %s1608_s13 = smov 112   ;;  %539 = vmatpush.msra.mxu1 %v574_v2  ;;  %vm885_vm1 = vcmask 130112   ;;  %vm980_vm2 = vcmask 195712   ;;  %vm1075_vm3 = vcmask 261312   ;;  %vm1086_vm4 = vcmask 261120  }
  0x21   : > { %s489_s22 = scalar_select %p488_p0, %s1597_s16, 1  ;;  %vm1194_vm9 = vcmask 523264  }
  0x22   : > { %s1609_s29 = smov 120   ;;  %s1610_s21 = smov 104   ;;  %642 = vmatpush.msrb.mxu1 %v574_v2 }
  0x23   : > { %s1359_s24 = sshll.u32 %s489_s22, 3  ;;  %s1960_s1 = sld [smem:[#allocation14_spill]] }
  0x24   : > { %s1611_s22 = smov 8   ;;  %s1613_s19 = smov 24  }
  0x25   : > { %s491_s27 = scalar_lea.vmem %s1958_s0, %s1359_s24  ;;  %s1612_s24 = smov 16  }
  0x26   : > { %v1753_v0 = vld [vmem:[%s491_s27] sm:$0xff]  ;;  %s1961_s0 = sld [smem:[#allocation17_spill]] }
  0x27   : > { %v497_v1 = vld [vmem:[%s1959_s2] sm:$0xff]  ;;  %600 = vrot.lane.b32.xlu1 %v1753_v0, %s1608_s13  ;;  %548 = vrot.lane.b32.xlu0 %v1753_v0, %s1609_s29 }
  0x28   : > { %517 = vmatpush.msra.mxu0 %v497_v1  ;;  %567 = vmatpush.msra.mxu3 %v497_v1 }
  0x29   : > { %1360 = vmatmul.msk.f32.vlgmr.msra.gmra.mxu0 %vm498_vm0, %v1753_v0  ;;  %671 = vmatpush.msra.mxu2 %v497_v1  ;;  %v704_v3 = vld [vmem:[%s1960_s1] sm:$0xff] }
  0x2a   : > { %619 = vmatpush.msrb.mxu0 %v497_v1  ;;  %590 = vmatpush.msrb.mxu3 %v574_v2 }
  0x2b   : > { %1361 = vmatmul.msk.f32.vlgmr.msra.gmra.mxu1 %vm498_vm0, %v1753_v0 }
  0x2c   : > { %724 = vmatpush.msra.mxu0 %v704_v3 }
  0x2f   : > { %652 = vrot.lane.b32.xlu0 %v1753_v0, %s1610_s21  ;;  %793 = vrot.lane.b32.xlu1 %v1753_v0, %s1609_s29 }
  0x37   : > { %888 = vrot.lane.b32.xlu0 %v1753_v0, %s1608_s13  ;;  %983 = vrot.lane.b32.xlu1 %v1753_v0, %s1610_s21  ;;  %s485_s13 = sand.u32 1, %s1589_s30   ;;  %s1388_s21 = sshll.u32 %s1597_s16, 3 }
  0x38   : > { %s1358_s29 = sshll.u32 %s485_s13, 3  ;;  %s1253_s3 = scalar_lea.sflag [#allocation7], %s485_s13 }
  0x39   : > { %s487_s1 = scalar_lea.vmem [#allocation8], %s1358_s29 }
  0x3a   : > { %s1266_s16 = sshll.u32 %s487_s1, 4  ;;  %s1267_s16 = int_to_ptr.vmem [resolvable:$true] %s1266_s16 }
  0x99   : > { %v601_v4 = vpop.permute.xlu1 %600  ;;  %v549_v5 = vpop.permute.xlu0 %548 }
  0x9a   : > { %1362 = vmatmul.msk.f32.vlgmr.msra.gmra.mxu3 %vm498_vm0, %v549_v5  ;;  %1364 = vmatmul.msk.f32.vlgmr.msrb.gmra.mxu0 %vm498_vm0, %v601_v4 }
  0x9b   : > { %694 = vmatpush.msra.mxu3 %v574_v2  ;;  %1365 = vmatmul.msk.f32.vlgmr.msrb.gmra.mxu1 %vm498_vm0, %v601_v4 }
  0xa1   : > { %v653_v6 = vpop.permute.xlu0 %652  ;;  %v794_v8 = vpop.permute.xlu1 %793 }
  0xa2   : > { %1363 = vmatmul.msk.f32.vlgmr.msrb.gmra.mxu3 %vm498_vm0, %v549_v5  ;;  %1368 = vmatmul.msk.f32.vlgmr.msra.gmra.mxu0 %vm498_vm0, %v1753_v0 }
  0xa3   : > { %1366 = vmatmul.msk.f32.vlgmr.msra.gmra.mxu2 %vm498_vm0, %v653_v6  ;;  %812 = vmatpush.msrb.mxu3 %v704_v3 }
  0xa6   : > { %v519_v7 = vpop.f32.mrf.mxu0 }
  0xa7   : > { %522 = vst.msk [vmem:[#allocation2] sm:$0xff] %vm498_vm0, %v519_v7 }
  0xa8   : > { %v541_v9 = vpop.f32.mrf.mxu1 }
  0xa9   : > { %544 = vst.msk [vmem:[#allocation3] sm:$0xff] %vm498_vm0, %v541_v9  ;;  %v889_v34 = vpop.permute.xlu0 %888  ;;  %v984_v40 = vpop.permute.xlu1 %983 }
  0xaa   : > { %1367 = vmatmul.msk.f32.vlgmr.msra.gmra.mxu3 %vm498_vm0, %v653_v6 }
  0xae   : > { %v729_v10 = vld [vmem:[#allocation2] sm:$0xff] }
  0xaf   : > { %1369 = vmatpush.xpose.msk.msra.mxu1 %vm498_vm0, %v729_v10 }
  0xb0   : > { %v765_v24 = vld [vmem:[#allocation3] sm:$0xff] }
  0xb1   : > { %784 = vmatpush.msrb.mxu2 %v765_v24  ;;  %v1614_v24 = vmov 32.0  }
  0xb2   : > { %1372 = vmatmul.msk.f32.vlgmr.msrb.gmra.mxu3 %vm498_vm0, %v794_v8 }
  0xb3   : > { %907 = vmatpush.msra.mxu2 %v704_v3 }
 0x117   : > { %v621_v11 = vpop.f32.mrf.mxu0 }
 0x118   : > { %625 = vst.msk [vmem:[#allocation2 + $0x10] sm:$0xff] %vm498_vm0, %v621_v11  ;;  %v644_v12 = vpop.f32.mrf.mxu1 }
 0x119   : > { %648 = vst.msk [vmem:[#allocation3 + $0x10] sm:$0xff] %vm498_vm0, %v644_v12  ;;  %v1081_v12 = vld [vmem:[%s1935_s4 + $0x18] sm:$0xff] }
 0x11d   : > { %v569_v13 = vpop.f32.mrf.mxu3 }
 0x11e   : > { %573 = vst.msk [vmem:[#allocation2 + $0x8] sm:$0xff] %vm498_vm0, %v569_v13  ;;  %v1080_v13 = vld [vmem:[%s1935_s4 + $0x10] sm:$0xff] }
 0x11f   : > { %v726_v14 = vpop.f32.mrf.mxu0  ;;  %v913_v15 = vld [vmem:[#allocation2 + $0x10] sm:$0xff] }
 0x120   : > { %1370 = vmatmul.msk.f32.vlgmr.msra.gmra.mxu1 %vm498_vm0, %v726_v14  ;;  %1377 = vmatpush.xpose.msk.msra.mxu3 %vm498_vm0, %v913_v15  ;;  %v950_v16 = vld [vmem:[#allocation3 + $0x10] sm:$0xff]  ;;  %v1079_v14 = vld [vmem:[%s1935_s4 + $0x8] sm:$0xff]  ;;  %v1078_v15 = vld [vmem:[%s1935_s4] sm:$0xff] }
 0x125   : > { %v592_v17 = vpop.f32.mrf.mxu3  ;;  %v818_v18 = vld [vmem:[#allocation2 + $0x8] sm:$0xff] }
 0x126   : > { %596 = vst.msk [vmem:[#allocation3 + $0x8] sm:$0xff] %vm498_vm0, %v592_v17  ;;  %1373 = vmatpush.xpose.msk.msrb.mxu0 %vm498_vm0, %v818_v18  ;;  %v673_v19 = vpop.f32.mrf.mxu2 }
 0x127   : > { %677 = vst.msk [vmem:[#allocation2 + $0x18] sm:$0xff] %vm498_vm0, %v673_v19  ;;  %v1464_v19 = vld [vmem:[%s1936_s5] ss:$0 sm:$0xff] }
 0x12a   : > { %969 = vmatpush.msra.mxu0 %v950_v16 }
 0x12d   : > { %v696_v20 = vpop.f32.mrf.mxu3  ;;  %v855_v21 = vld [vmem:[#allocation3 + $0x8] sm:$0xff] }
 0x12e   : > { %700 = vst.msk [vmem:[#allocation3 + $0x18] sm:$0xff] %vm498_vm0, %v696_v20  ;;  %874 = vmatpush.msrb.mxu1 %v855_v21  ;;  %v1008_v33 = vld [vmem:[#allocation2 + $0x18] sm:$0xff] }
 0x130   : > { %1002 = vmatpush.msra.mxu1 %v704_v3 }
 0x135   : > { %v814_v22 = vpop.f32.mrf.mxu3  ;;  %v1045_v23 = vld [vmem:[#allocation3 + $0x18] sm:$0xff] }
 0x136   : > { %1374 = vmatmul.msk.f32.vlgmr.msrb.gmra.mxu0 %vm498_vm0, %v814_v22  ;;  %1064 = vmatpush.msrb.mxu3 %v1045_v23 }
 0x137   : > { %1102 = vmatpush.msrb.mxu0 %v1081_v12 }
 0x139   : > { %1103 = vmatpush.msrb.mxu0 %v1080_v13 }
 0x13b   : > { %1104 = vmatpush.msrb.mxu0 %v1079_v14 }
 0x13d   : > { %1105 = vmatpush.msrb.mxu0 %v1078_v15 }
 0x19d   : > { %v753_v25 = vpop.f32.mrf.mxu1 }
 0x19e   : > { %v756_v26 = vsel %vm498_vm0, %v753_v25, -inf }
 0x19f   : > { %757 = vmax.xlane.f32.xlu2 %v756_v26 }
 0x1b3   : > { %v842_v27 = vpop.f32.mrf.mxu0 }
 0x1b4   : > { %v845_v28 = vsel %vm498_vm0, %v842_v27, -inf }
 0x1b5   : > { %846 = vmax.xlane.f32.xlu2 %v845_v28 }
 0x212   : > { %v758_v29 = vpop.xlane.xlu2 %757 }
 0x213   : > { %v759_v30 = vsub.f32 %v753_v25, %v758_v29 }
 0x215   : > { %v760_v31 = vmul.f32 1.442695, %v759_v30 }
 0x217   : > { %1471 = vpow2.f32 %v760_v31 }
 0x21d   : > { %v1472_v32 = vpop.eup %1471 }
 0x21e   : > { %1371 = vmatmul.msk.f32.vlgmr.msrb.gmra.mxu2 %vm498_vm0, %v1472_v32  ;;  %v762_v59 = vsel %vm498_vm0, %v1472_v32, 0.0 }
 0x21f   : > { %1381 = vmatpush.xpose.msk.msrb.mxu2 %vm498_vm0, %v1008_v33 }
 0x226   : > { %1376 = vmatmul.msk.f32.vlgmr.msra.gmra.mxu2 %vm498_vm0, %v889_v34 }
 0x228   : > { %v847_v35 = vpop.xlane.xlu2 %846 }
 0x229   : > { %v848_v36 = vsub.f32 %v842_v27, %v847_v35  ;;  %v1153_v35 = vld [vmem:[%s1939_s8 + $0x18] sm:$0xff] }
 0x22b   : > { %v849_v37 = vmul.f32 1.442695, %v848_v36  ;;  %v1152_v36 = vld [vmem:[%s1939_s8 + $0x10] sm:$0xff] }
 0x22d   : > { %1473 = vpow2.f32 %v849_v37  ;;  %v1151_v37 = vld [vmem:[%s1939_s8 + $0x8] sm:$0xff] }
 0x233   : > { %v1474_v38 = vpop.eup %1473 }
 0x234   : > { %1375 = vmatmul.msk.f32.vlgmr.msrb.gmra.mxu1 %vm498_vm0, %v1474_v38  ;;  %v851_v39 = vsel %vm498_vm0, %v1474_v38, 0.0  ;;  %v1150_v38 = vld [vmem:[%s1939_s8] sm:$0xff] }
 0x235   : > { %852 = vadd.xlane.f32.xlu1 %v851_v39  ;;  %1173 = vmatpush.msrb.mxu1 %v1153_v35  ;;  %v1189_v39 = vld [vmem:[%s1941_s10 + $0x38] sm:$0xff] }
 0x236   : > { %1206 = vmatpush.msra.mxu2 %v1189_v39 }
 0x237   : > { %1174 = vmatpush.msrb.mxu1 %v1152_v36 }
 0x239   : > { %1175 = vmatpush.msrb.mxu1 %v1151_v37 }
 0x23b   : > { %1176 = vmatpush.msrb.mxu1 %v1150_v38 }
 0x23c   : > { %1380 = vmatmul.msk.f32.vlgmr.msra.gmra.mxu1 %vm498_vm0, %v984_v40  ;;  %v1188_v40 = vld [vmem:[%s1941_s10 + $0x30] sm:$0xff] }
 0x23d   : > { %1207 = vmatpush.msra.mxu2 %v1188_v40 }
 0x2a1   : > { %v786_v41 = vpop.f32.mrf.mxu2 }
 0x2a8   : > { %v853_v60 = vpop.xlane.xlu1 %852 }
 0x2a9   : > { %v909_v42 = vpop.f32.mrf.mxu2 }
 0x2aa   : > { %1378 = vmatmul.msk.f32.vlgmr.msra.gmra.mxu3 %vm498_vm0, %v909_v42 }
 0x2b1   : > { %v876_v43 = vpop.f32.mrf.mxu1 }
 0x2b9   : > { %v1004_v44 = vpop.f32.mrf.mxu1 }
 0x2ba   : > { %1382 = vmatmul.msk.f32.vlgmr.msrb.gmra.mxu2 %vm498_vm0, %v1004_v44  ;;  %v1186_v44 = vld [vmem:[%s1941_s10 + $0x20] sm:$0xff] }
 0x32d   : > { %v937_v45 = vpop.f32.mrf.mxu3 }
 0x32e   : > { %v940_v46 = vsel %vm498_vm0, %v937_v45, -inf }
 0x32f   : > { %941 = vmax.xlane.f32.xlu0 %v940_v46  ;;  %v1185_v46 = vld [vmem:[%s1941_s10 + $0x18] sm:$0xff] }
 0x33d   : > { %v1032_v47 = vpop.f32.mrf.mxu2 }
 0x33e   : > { %v1035_v48 = vsel %vm498_vm0, %v1032_v47, -inf }
 0x33f   : > { %1036 = vmax.xlane.f32.xlu2 %v1035_v48 }
 0x3a2   : > { %v942_v49 = vpop.xlane.xlu0 %941 }
 0x3a3   : > { %v943_v50 = vsub.f32 %v937_v45, %v942_v49 }
 0x3a5   : > { %v944_v51 = vmul.f32 1.442695, %v943_v50 }
 0x3a7   : > { %1475 = vpow2.f32 %v944_v51 }
 0x3ad   : > { %v1476_v52 = vpop.eup %1475 }
 0x3ae   : > { %1379 = vmatmul.msk.f32.vlgmr.msra.gmra.mxu0 %vm498_vm0, %v1476_v52  ;;  %v946_v53 = vsel %vm498_vm0, %v1476_v52, 0.0 }
 0x3af   : > { %947 = vadd.xlane.f32.xlu2 %v946_v53  ;;  %v1465_v53 = vld [vmem:[%s1937_s6] ss:$0 sm:$0xff] }
 0x3b2   : > { %v1037_v54 = vpop.xlane.xlu2 %1036 }
 0x3b3   : > { %v1038_v55 = vsub.f32 %v1032_v47, %v1037_v54 }
 0x3b5   : > { %v1039_v56 = vmul.f32 1.442695, %v1038_v55 }
 0x3b7   : > { %1477 = vpow2.f32 %v1039_v56  ;;  %v1466_v56 = vld [vmem:[%s1938_s7] ss:$0 sm:$0xff] }
 0x3b8   : > { %1479 = vrcp.f32 %v853_v60  ;;  %v1183_v60 = vld [vmem:[%s1941_s10 + $0x8] sm:$0xff] }
 0x3bd   : > { %v1478_v57 = vpop.eup %1477 }
 0x3be   : > { %1383 = vmatmul.msk.f32.vlgmr.msrb.gmra.mxu3 %vm498_vm0, %v1478_v57  ;;  %v1041_v58 = vsel %vm498_vm0, %v1478_v57, 0.0  ;;  %v1480_v61 = vpop.eup %1479 }
 0x3bf   : > { %1042 = vadd.xlane.f32.xlu2 %v1041_v58  ;;  %v880_v62 = vmul.f32 %v1480_v61, %v876_v43  ;;  %v1182_v61 = vld [vmem:[%s1941_s10] sm:$0xff] }
 0x3c7   : > { %763 = vadd.xlane.f32.xlu2 %v762_v59  ;;  %v1184_v59 = vld [vmem:[%s1941_s10 + $0x10] sm:$0xff] }
 0x3df   : > { %882 = vrot.lane.b32.xlu2 %v880_v62, %s1611_s22  ;;  %v1467_v62 = vld [vmem:[%s1940_s9] ss:$0 sm:$0xff] }
 0x422   : > { %v948_v63 = vpop.xlane.xlu2 %947 }
 0x423   : > { %1481 = vrcp.f32 %v948_v63 }
 0x429   : > { %v1482_v1 = vpop.eup %1481 }
 0x42b   : > { %v971_v2 = vpop.f32.mrf.mxu0 }
 0x42c   : > { %v975_v3 = vmul.f32 %v1482_v1, %v971_v2 }
 0x42e   : > { %977 = vrot.lane.b32.xlu0 %v975_v3, %s1612_s24  ;;  %v1468_v3 = vld [vmem:[%s1942_s11] ss:$0 sm:$0xff] }
 0x432   : > { %v1043_v4 = vpop.xlane.xlu2 %1042 }
 0x433   : > { %1483 = vrcp.f32 %v1043_v4 }
 0x439   : > { %v1484_v6 = vpop.eup %1483 }
 0x43a   : > { %v764_v5 = vpop.xlane.xlu2 %763 }
 0x43b   : > { %1485 = vrcp.f32 %v764_v5 }
 0x43c   : > { %1487 = vrcp.f32 %v1614_v24 }
 0x441   : > { %v1486_v7 = vpop.eup %1485  ;;  %v1066_v8 = vpop.f32.mrf.mxu3 }
 0x442   : > { %v790_v9 = vmul.f32 %v1486_v7, %v786_v41  ;;  %v1070_v10 = vmul.f32 %v1484_v6, %v1066_v8  ;;  %v883_v11 = vpop.permute.xlu2 %882  ;;  %v1488_v25 = vpop.eup %1487  ;;  %v1187_v41 = vld [vmem:[%s1941_s10 + $0x28] sm:$0xff] }
 0x443   : > { %v1115_v26 = vmul.f32 32.0, %v1488_v25  ;;  %vm1119_vm5 = vweird.f32 %v1488_v25  ;;  %1208 = vmatpush.msra.mxu2 %v1187_v41 }
 0x444   : > { %791 = vst.msk [vmem:[#allocation4] sm:$0xff] %vm498_vm0, %v790_v9  ;;  %1072 = vrot.lane.b32.xlu1 %v1070_v10, %s1613_s19  ;;  %s1264_s19 = scalar_lea.hbm %s1945_s14, %s1388_s21 }
 0x445   : > { %886 = vst.msk [vmem:[#allocation4] sm:$0xff] %vm885_vm1, %v883_v11  ;;  %v1116_v27 = vsub.f32 1.0, %v1115_v26  ;;  %1209 = vmatpush.msra.mxu2 %v1186_v44  ;;  %s1268_s2 = sshll.u32 %s1264_s19, 4  ;;  %s1269_s2 = int_to_ptr.hbm [resolvable:$true] %s1268_s2 }
 0x446   : > { %s1537_s20 = sshra.s32 %s1269_s2, 4  ;;  %s1538_s20 = int_to_ptr.hbm [resolvable:$true] %s1537_s20 }
 0x447   : > { %v1117_v28 = vmul.f32 %v1488_v25, %v1116_v27  ;;  %1210 = vmatpush.msra.mxu2 %v1185_v46  ;;  %s1539_s21 = scalar_lea.hbm %s1538_s20, 8  ;;  %p1544_p5 = scmp.lt.s32.totalorder %s1538_s20, %s1945_s14 }
 0x448   : > { %p1540_p1 = scmp.ne.s32.totalorder %s1538_s20, %s1539_s21 }
 0x449   : > { %v1118_v29 = vadd.f32 %v1488_v25, %v1117_v28  ;;  %1211 = vmatpush.msra.mxu2 %v1184_v59 }
 0x44a   : > { %p1541_p2 = pnand %p1540_p1, %p1730_p4 }
 0x44b   : > { %v1829_v30 = vsel %vm1119_vm5, %v1488_v25, %v1118_v29  ;;  %1212 = vmatpush.msra.mxu2 %v1183_v60  ;;  %v1470_v25 = vld [vmem:[%s1961_s0] ss:$0 sm:$0xff]  ;;  %s1543_s0 = scalar_lea.hbm %s1945_s14, 16 }
 0x44c   : > { %p1542_p3 = pneg %p1541_p2  ;;  %p1545_p6 = scmp.lt.s32.totalorder %s1543_s0, %s1539_s21 }
 0x44d   : > { %1213 = vmatpush.msra.mxu2 %v1182_v61 }
 0x44e   : > { %p1546_p7 = por %p1545_p6, %p1544_p5 }
 0x450   : > { %p1547_p9 = pnand %p1546_p7, %p1542_p3 }
 0x4a0   : > { %v978_v16 = vpop.permute.xlu0 %977 }
 0x4a1   : > { %981 = vst.msk [vmem:[#allocation4] sm:$0xff] %vm980_vm2, %v978_v16 }
 0x4b6   : > { %v1073_v17 = vpop.permute.xlu1 %1072 }
 0x4b7   : > { %1076 = vst.msk [vmem:[#allocation4] sm:$0xff] %vm1075_vm3, %v1073_v17 }
 0x4be   : > { %v1077_v18 = vld [vmem:[#allocation4] sm:$0xff] }
 0x4bf   : > { %1384 = vmatmul.msk.f32.vlgmr.msrb.gmra.mxu0 %vm1086_vm4, %v1077_v18 }
 0x53c   : > { %v1107_v20 = vpop.f32.mrf.mxu0 }
 0x53d   : > { %v1108_v21 = vadd.f32 %v1464_v19, %v1107_v20 }
 0x53f   : > { %v1110_v22 = vadd.f32 %v1108_v21, %v1753_v0 }
 0x541   : > { %v1111_v23 = vsel %vm1086_vm4, %v1110_v22, 0.0 }
 0x542   : > { %1112 = vadd.xlane.f32.xlu2 %v1111_v23 }
 0x5b5   : > { %v1113_v31 = vpop.xlane.xlu2 %1112 }
 0x5b6   : > { %v1121_v32 = vmul.f32 %v1829_v30, %v1113_v31 }
 0x5b8   : > { %v1122_v33 = vsub.f32 %v1110_v22, %v1121_v32  ;;  %v1469_v22 = vld [vmem:[%s1943_s12] ss:$0 sm:$0xff] }
 0x5ba   : > { %v1123_v34 = vmul.f32 %v1122_v33, %v1122_v33 }
 0x5bc   : > { %v1124_v0 = vsel %vm1086_vm4, %v1123_v34, 0.0 }
 0x5bd   : > { %1125 = vadd.xlane.f32.xlu0 %v1124_v0 }
 0x630   : > { %v1126_v42 = vpop.xlane.xlu0 %1125 }
 0x631   : > { %v1127_v43 = vmul.f32 %v1126_v42, %v1829_v30 }
 0x633   : > { %v1128_v45 = vadd.f32 1e-05, %v1127_v43 }
 0x635   : > { %1489 = vrsqrt.f32 %v1128_v45  ;;  %vm1135_vm7 = vweird.f32 %v1128_v45 }
 0x63b   : > { %v1490_v47 = vpop.eup %1489 }
 0x63c   : > { %v1130_v48 = vmul.f32 %v1490_v47, %v1128_v45  ;;  %vm1136_vm6 = vweird.f32 %v1490_v47 }
 0x63d   : > { %vm1137_vm8 = vmor %vm1135_vm7, %vm1136_vm6 }
 0x63e   : > { %v1131_v49 = vmul.f32 %v1490_v47, %v1130_v48 }
 0x640   : > { %v1132_v50 = vmul.f32 0.5, %v1131_v49 }
 0x642   : > { %v1133_v51 = vsub.f32 1.5, %v1132_v50 }
 0x644   : > { %v1134_v52 = vmul.f32 %v1490_v47, %v1133_v51 }
 0x646   : > { %v1138_v54 = vsel %vm1137_vm8, %v1490_v47, %v1134_v52 }
 0x647   : > { %v1139_v55 = vmul.f32 %v1138_v54, %v1122_v33 }
 0x649   : > { %v1144_v57 = vmul.f32 %v1465_v53, %v1139_v55 }
 0x64b   : > { %v1149_v58 = vadd.f32 %v1466_v56, %v1144_v57 }
 0x64d   : > { %1385 = vmatmul.msk.f32.vlgmr.msrb.gmra.mxu1 %vm1086_vm4, %v1149_v58 }
 0x6ca   : > { %v1178_v63 = vpop.f32.mrf.mxu1 }
 0x6cb   : > { %v1179_v1 = vadd.f32 %v1467_v62, %v1178_v63 }
 0x6cd   : > { %v1181_v2 = vmax.f32 %v1179_v1, 0.0 }
 0x6cf   : > { %1386 = vmatmul.msk.f32.vlgmr.msra.gmra.mxu2 %vm1194_vm9, %v1181_v2 }
 0x752   : > { %v1215_v4 = vpop.f32.mrf.mxu2 }
 0x753   : > { %v1216_v5 = vadd.f32 %v1468_v3, %v1215_v4 }
 0x755   : > { %v1218_v6 = vadd.f32 %v1216_v5, %v1149_v58 }
 0x757   : > { %v1219_v7 = vsel %vm1086_vm4, %v1218_v6, 0.0 }
 0x758   : > { %1220 = vadd.xlane.f32.xlu1 %v1219_v7 }
 0x7cb   : > { %v1221_v8 = vpop.xlane.xlu1 %1220 }
 0x7cc   : > { %v1222_v9 = vmul.f32 %v1221_v8, %v1829_v30 }
 0x7ce   : > { %v1223_v10 = vsub.f32 %v1218_v6, %v1222_v9 }
 0x7d0   : > { %v1224_v11 = vmul.f32 %v1223_v10, %v1223_v10 }
 0x7d2   : > { %v1225_v12 = vsel %vm1086_vm4, %v1224_v11, 0.0 }
 0x7d3   : > { %1226 = vadd.xlane.f32.xlu2 %v1225_v12 }
 0x846   : > { %v1227_v13 = vpop.xlane.xlu2 %1226 }
 0x847   : > { %v1228_v14 = vmul.f32 %v1227_v13, %v1829_v30 }
 0x849   : > { %v1229_v15 = vadd.f32 1e-05, %v1228_v14 }
 0x84b   : > { %1491 = vrsqrt.f32 %v1229_v15  ;;  %vm1236_vm11 = vweird.f32 %v1229_v15 }
 0x851   : > { %v1492_v16 = vpop.eup %1491 }
 0x852   : > { %v1231_v17 = vmul.f32 %v1492_v16, %v1229_v15  ;;  %vm1237_vm10 = vweird.f32 %v1492_v16 }
 0x853   : > { %vm1238_vm12 = vmor %vm1236_vm11, %vm1237_vm10 }
 0x854   : > { %v1232_v18 = vmul.f32 %v1492_v16, %v1231_v17 }
 0x856   : > { %v1233_v19 = vmul.f32 0.5, %v1232_v18 }
 0x858   : > { %v1234_v20 = vsub.f32 1.5, %v1233_v19 }
 0x85a   : > { %v1235_v21 = vmul.f32 %v1492_v16, %v1234_v20 }
 0x85c   : > { %v1239_v23 = vsel %vm1238_vm12, %v1492_v16, %v1235_v21 }
 0x85d   : > { %v1240_v24 = vmul.f32 %v1239_v23, %v1223_v10 }
 0x85f   : > { %v1245_v26 = vmul.f32 %v1469_v22, %v1240_v24 }
 0x861   : > { %v1250_v27 = vadd.f32 %v1470_v25, %v1245_v26 }
 0x863   : > { %1251 = vst.msk [vmem:[%s487_s1] sm:$0xff] %vm1086_vm4, %v1250_v27 }
 0x864   : > { %1550 = shalt.err (!%p1547_p9)
}
 0x865   : > { %1395 = dma.vmem_to_hbm [thread:$0]  (%p1730_p4), %s1267_s16, 128, %s1269_s2, %s1253_s3  }
 0x866 PF: > { %s1962_s1 = sld [smem:[#allocation11_spill]]  ;;  %p1407_p10 = scmp.ge.s32.totalorder %s1605_s18, 2 }
 0x868   : > { %p1402_p11 = pnand %p1407_p10, %p1737_p8 }
 0x86a   : > { %p1403_p12 = pneg %p1402_p11 }
 0x86c   : > { %s1280_s13 = sand.u32 1, %s1962_s1  }
 0x86d   : > { %s1281_s27 = scalar_lea.sflag [#allocation7], %s1280_s13 }
 0x86e   : > { %1580 = dma.done.wait (%p1403_p12), %s1281_s27, 128  }
 0x86f   : > { %1582 = vsyncadd (%p1403_p12), %s1281_s27, 4294967168  ;;  %s28_s18 = sadd.s32 1, %s1605_s18   ;;  %s1963_s2 = sld [smem:[#allocation12_spill]] }
 0x870   : > { %p25_p13 = scmp.ge.s32.totalorder %s28_s18, 4   ;;  %s1964_s29 = smov %s1589_s30 }
 0x871   : > { %s1965_s30 = smov %s1593_s15  ;;  %s1966_s15 = smov %s1743_s26 }
 0x872   : > { %s1967_s16 = smov %s1601_s17  ;;  %27 = sbr.rel (!%p25_p13) target bundleno = 11 (0xb), region = 133 }
 0x875   : > { %s1968_s17 = smov %s1963_s2 }
 0x877   :  { %1287 = vsyncpa [#allocation6], 1 }
 0x878   :  { %1289 = vsyncpa [#allocation6 + $0x1], 1 }
 0x879   :  { %1290 = vsyncpa [#allocation7], 1 }
 0x87a   :  { %1292 = vsyncpa [#allocation7 + $0x1], 1 }

</bundles_post_ra>
